<compile_context>
chip_gen: v5e
topology: v5e:2x2
jax: 0.10.0
libtpu: 0.0.40
codegen_flags: <defaults>
</compile_context>

<pallas_src>
import functools

import jax
import jax.numpy as jnp
from jax.experimental import pallas as pl
from jax.experimental.pallas import tpu as pltpu


# ---------------------------------------------------------------------------
# Generation-aware tiling constants.
# ---------------------------------------------------------------------------
def _vmem_capacity_bytes():
    try:
        info = pltpu.get_tpu_info()
        cap = int(getattr(info, "vmem_capacity_bytes", 0))
        if cap > 0:
            return cap
    except Exception:
        pass
    return 64 << 20  # conservative fallback (v7x per-TensorCore VMEM)


def _tiling_params():
    vmem = _vmem_capacity_bytes()
    if vmem <= (64 << 20):
        # v7x-class: 64 MiB VMEM per TensorCore, 2 TCs per chip.
        row_block_cap = 3 << 20
        single_pass_max = 8 << 20
        vlim_cap = min(48 << 20, (vmem * 3) // 4)
    else:
        # v5e / v6e: 128 MiB VMEM, single TensorCore.
        row_block_cap = 4 << 20
        single_pass_max = 16 << 20
        vlim_cap = min(96 << 20, (vmem * 3) // 4)
    return row_block_cap, single_pass_max, vlim_cap


# ---------------------------------------------------------------------------
# Kernel 1: single-pass AdaIN over full rows (whole H*W fits in the block).
#   Each row = one (sample, channel) instance; biased variance, eps=1e-5
#   (matches nn.InstanceNorm2d defaults, no affine).
# ---------------------------------------------------------------------------
def _adain_onepass_kernel(x_ref, scale_ref, shift_ref, o_ref, *, inv_hw):
    x = x_ref[...].astype(jnp.float32)                       # (TR, HW)
    mean = jnp.sum(x, axis=-1, keepdims=True) * inv_hw       # (TR, 1)
    var = jnp.maximum(
        jnp.sum(x * x, axis=-1, keepdims=True) * inv_hw - mean * mean, 0.0)
    a = scale_ref[...].astype(jnp.float32) * jax.lax.rsqrt(var + 1e-5)
    b = shift_ref[...].astype(jnp.float32) - mean * a
    o_ref[...] = (x * a + b).astype(o_ref.dtype)


# ---------------------------------------------------------------------------
# Kernel 2a/2b: two-pass AdaIN for very large H*W (HW tiled on the lane axis).
#   Stats accumulate into the resident output blocks (no extra scratch) and
#   emit a = scale*rstd, b = shift - mean*a; apply is a pure FMA.
# ---------------------------------------------------------------------------
def _row_stats_kernel(x_ref, scale_ref, shift_ref, a_ref, b_ref, *, inv_hw):
    h = pl.program_id(1)

    @pl.when(h == 0)
    def _():
        a_ref[...] = jnp.zeros_like(a_ref)   # running sum(x)
        b_ref[...] = jnp.zeros_like(b_ref)   # running sum(x^2)

    x = x_ref[...].astype(jnp.float32)       # (TR, THW)
    a_ref[...] += jnp.sum(x, axis=-1, keepdims=True)
    b_ref[...] += jnp.sum(x * x, axis=-1, keepdims=True)

    @pl.when(h == pl.num_programs(1) - 1)
    def _():
        mean = a_ref[...] * inv_hw
        var = jnp.maximum(b_ref[...] * inv_hw - mean * mean, 0.0)
        a = scale_ref[...].astype(jnp.float32) * jax.lax.rsqrt(var + 1e-5)
        a_ref[...] = a
        b_ref[...] = shift_ref[...].astype(jnp.float32) - mean * a


def _row_apply_kernel(x_ref, a_ref, b_ref, o_ref):
    o_ref[...] = (x_ref[...].astype(jnp.float32) * a_ref[...]
                  + b_ref[...]).astype(o_ref.dtype)


# ---------------------------------------------------------------------------
# Tiling heuristics.
# ---------------------------------------------------------------------------
def _choose_row_tile(nc, hw, itemsize, cap_bytes):
    """Row tile sized purely from the per-block byte cap (multiple of 8)."""
    row_bytes = max(hw * itemsize, 1)
    cap_rows = max(8, (cap_bytes // row_bytes) // 8 * 8)
    tr = min(cap_rows, nc)
    # Keep >= 2 grid steps when there are enough rows so both v7x TensorCores
    # get work on the "parallel" row axis (harmless no-op on v5e/v6e).
    if nc >= 16:
        tr = min(tr, max(8, (nc // 2) // 8 * 8))
    if tr >= nc:
        return nc
    return tr


def _choose_hw_tile(hw, itemsize, tr, cap_bytes):
    if hw % 128 != 0:
        return None
    max_lanes = max(128, (cap_bytes // max(tr * itemsize, 1)) // 128 * 128)
    t = min(max_lanes, hw) // 128 * 128
    while t >= 128:
        if hw % t == 0:
            return t
        t -= 128
    return None


def _adain_rows(x_rows, scale, shift, *, hw_tile=None):
    nc, hw = x_rows.shape
    itemsize = x_rows.dtype.itemsize
    row_cap, single_max, vlim_cap = _tiling_params()

    tr = _choose_row_tile(nc, hw, itemsize, row_cap)
    grid_r = pl.cdiv(nc, tr)
    single_block_bytes = tr * hw * itemsize

    if hw_tile is not None:
        thw_stats = thw_apply = (hw_tile if hw_tile < hw else None)
        if thw_apply is not None:
            assert hw % hw_tile == 0 and hw_tile % 128 == 0, "bad hw_tile"
    elif single_block_bytes <= single_max:
        thw_stats = thw_apply = None
    else:
        # Stats kernel only pipelines the x input (its outputs are tiny rows),
        # so it can take a 2x larger lane tile than the apply kernel.
        thw_stats = _choose_hw_tile(hw, itemsize, tr, 2 * row_cap)
        thw_apply = _choose_hw_tile(hw, itemsize, tr, row_cap)
        # TODO(synk): if thw_* is None here (huge HW that is not a multiple of
        # 128) we fall back to the single-pass whole-row path; a masked
        # ragged-HW accumulation path (or host-side padding) is needed to keep
        # that inside the VMEM limit on v7x.

    if thw_apply is None:
        # Single pass: whole row per block, one read + one write of x.
        # vmem_limit covers double-buffered input + output blocks + headroom.
        vlim = int(min(max(32 << 20, 4 * single_block_bytes + (2 << 20)),
                       vlim_cap))
        return pl.pallas_call(
            functools.partial(_adain_onepass_kernel, inv_hw=1.0 / hw),
            out_shape=jax.ShapeDtypeStruct((nc, hw), x_rows.dtype),
            grid=(grid_r,),
            in_specs=[pl.BlockSpec((tr, hw), lambda r: (r, 0)),
                      pl.BlockSpec((tr, 1), lambda r: (r, 0)),
                      pl.BlockSpec((tr, 1), lambda r: (r, 0))],
            out_specs=pl.BlockSpec((tr, hw), lambda r: (r, 0)),
            compiler_params=pltpu.CompilerParams(
                dimension_semantics=("parallel",),
                vmem_limit_bytes=vlim),
        )(x_rows, scale, shift)

    # Two-pass path: HW tiled as well (stats accumulate, then apply).
    stats_block = tr * thw_stats * itemsize
    vlim_stats = int(min(max(32 << 20, 2 * stats_block + (2 << 20)), vlim_cap))
    a_rows, b_rows = pl.pallas_call(
        functools.partial(_row_stats_kernel, inv_hw=1.0 / hw),
        out_shape=(jax.ShapeDtypeStruct((nc, 1), jnp.float32),
                   jax.ShapeDtypeStruct((nc, 1), jnp.float32)),
        grid=(grid_r, hw // thw_stats),
        in_specs=[pl.BlockSpec((tr, thw_stats), lambda r, h: (r, h)),
                  pl.BlockSpec((tr, 1), lambda r, h: (r, 0)),
                  pl.BlockSpec((tr, 1), lambda r, h: (r, 0))],
        out_specs=(pl.BlockSpec((tr, 1), lambda r, h: (r, 0)),
                   pl.BlockSpec((tr, 1), lambda r, h: (r, 0))),
        compiler_params=pltpu.CompilerParams(
            dimension_semantics=("parallel", "arbitrary"),
            vmem_limit_bytes=vlim_stats),
    )(x_rows, scale, shift)

    apply_block = tr * thw_apply * itemsize
    vlim_apply = int(min(max(32 << 20, 4 * apply_block + (2 << 20)), vlim_cap))
    return pl.pallas_call(
        _row_apply_kernel,
        out_shape=jax.ShapeDtypeStruct((nc, hw), x_rows.dtype),
        grid=(grid_r, hw // thw_apply),
        in_specs=[pl.BlockSpec((tr, thw_apply), lambda r, h: (r, h)),
                  pl.BlockSpec((tr, 1), lambda r, h: (r, 0)),
                  pl.BlockSpec((tr, 1), lambda r, h: (r, 0))],
        out_specs=pl.BlockSpec((tr, thw_apply), lambda r, h: (r, h)),
        compiler_params=pltpu.CompilerParams(
            dimension_semantics=("parallel", "parallel"),
            vmem_limit_bytes=vlim_apply),
    )(x_rows, a_rows, b_rows)


# ---------------------------------------------------------------------------
# Module-equivalent wrapper.
# ---------------------------------------------------------------------------
def adaptive_instance_norm(x_and_w, params, *, hw_tile=None):
    x, w = x_and_w                       # x: (N, C, H, W), w: (N, w_dim)
    N, C, H, W = x.shape
    w_dim = w.shape[1]
    s = (2.0 / w_dim) ** 0.5

    # Tiny (N, w_dim) x (w_dim, C) style matmuls: plain XLA.  At this size the
    # MXU would be <1% utilized and a Pallas call is pure launch/DMA overhead.
    # Emit scale/shift directly in the (N*C, 1) layout the AdaIN kernel wants.
    wf = w.astype(jnp.float32) * s
    scale = (wf @ params["weight_scale"].astype(jnp.float32).T
             + params["bias_scale"].astype(jnp.float32) * s)          # (N, C)
    shift = (wf @ params["weight_shift"].astype(jnp.float32).T
             + params["bias_shift"].astype(jnp.float32) * s)          # (N, C)
    scale = scale.reshape(N * C, 1)
    shift = shift.reshape(N * C, 1)

    x_rows = x.reshape(N * C, H * W)
    out = _adain_rows(x_rows, scale, shift, hw_tile=hw_tile)
    return out.reshape(N, C, H, W), w


# ---------------------------------------------------------------------------
# Pure-JAX reference (mirrors the PyTorch forward) for a sanity check.
# ---------------------------------------------------------------------------
def _reference(x_and_w, params):
    x, w = x_and_w
    w_dim = w.shape[1]
    s = (2.0 / w_dim) ** 0.5
    scale = (w * s) @ params["weight_scale"].T + params["bias_scale"] * s
    shift = (w * s) @ params["weight_shift"].T + params["bias_shift"] * s
    mean = jnp.mean(x, axis=(2, 3), keepdims=True)
    var = jnp.mean((x - mean) ** 2, axis=(2, 3), keepdims=True)
    x_norm = (x - mean) / jnp.sqrt(var + 1e-5)
    return scale[:, :, None, None] * x_norm + shift[:, :, None, None], w


if __name__ == "__main__":
    # Small shapes consistent with the module: batch=2, channels=4,
    # spatial=16x16, w_dim=32.
    N, C, H, W, W_DIM = 2, 4, 16, 16, 32

    key = jax.random.PRNGKey(0)
    kx, kw, ks, kb = jax.random.split(key, 4)

    x = jax.random.normal(kx, (N, C, H, W), dtype=jnp.float32)
    w = jax.random.normal(kw, (N, W_DIM), dtype=jnp.float32)

    # Weights ~ N(0,1), biases 0 (matches CLinear init).
    params = {
        "weight_scale": jax.random.normal(ks, (C, W_DIM), dtype=jnp.float32),
        "weight_shift": jax.random.normal(kb, (C, W_DIM), dtype=jnp.float32),
        "bias_scale": jnp.zeros((C,), dtype=jnp.float32),
        "bias_shift": jnp.zeros((C,), dtype=jnp.float32),
    }

    out, w_out = adaptive_instance_norm((x, w), params)
    out = jax.block_until_ready(out)

    ref_out, _ = _reference((x, w), params)
    assert out.shape == (N, C, H, W)
    assert jnp.allclose(out, ref_out, atol=1e-4, rtol=1e-4), "mismatch (1-pass)"
    assert jnp.array_equal(w_out, w)

    # Also exercise the two-pass (HW-tiled) path used for large spatial sizes.
    out2, _ = adaptive_instance_norm((x, w), params, hw_tile=128)
    out2 = jax.block_until_ready(out2)
    assert jnp.allclose(out2, ref_out, atol=1e-4, rtol=1e-4), "mismatch (2-pass)"

    print("KERNEL_OK")
</pallas_src>

<mosaic_0001>
module attributes {stable_mosaic.version = 11 : i64} {
  func.func @_adain_onepass_kernel(%arg0: i32, %arg1: memref<8x256xf32, #tpu.memory_space<vmem>>, %arg2: memref<8x1xf32, #tpu.memory_space<vmem>>, %arg3: memref<8x1xf32, #tpu.memory_space<vmem>>, %arg4: memref<8x256xf32, #tpu.memory_space<vmem>>) attributes {dimension_semantics = [#tpu.dimension_semantics<parallel>], iteration_bounds = array<i64: 1>, scalar_prefetch = 0 : i64, scratch_operands = 0 : i64, tpu.core_type = #tpu.core_type<tc>, window_params = [{transform_indices = @transform_0, window_bounds = array<i64: 8, 256>}, {transform_indices = @transform_1, window_bounds = array<i64: 8, 1>}, {transform_indices = @transform_2, window_bounds = array<i64: 8, 1>}, {transform_indices = @transform_3, window_bounds = array<i64: 8, 256>}]} {
    %c0 = arith.constant 0 : index
    %c0_0 = arith.constant 0 : index
    %0 = vector.load %arg1[%c0, %c0_0] : memref<8x256xf32, #tpu.memory_space<vmem>>, vector<8x256xf32>
    %cst = arith.constant dense<0.000000e+00> : vector<8xf32>
    %1 = vector.multi_reduction <add>, %0, %cst [1] : vector<8x256xf32> to vector<8xf32>
    %2 = vector.shape_cast %1 : vector<8xf32> to vector<8x1xf32>
    %cst_1 = arith.constant 3.906250e-03 : f32
    %3 = vector.broadcast %cst_1 : f32 to vector<8x1xf32>
    %4 = arith.mulf %2, %3 : vector<8x1xf32>
    %5 = arith.mulf %0, %0 : vector<8x256xf32>
    %cst_2 = arith.constant dense<0.000000e+00> : vector<8xf32>
    %6 = vector.multi_reduction <add>, %5, %cst_2 [1] : vector<8x256xf32> to vector<8xf32>
    %7 = vector.shape_cast %6 : vector<8xf32> to vector<8x1xf32>
    %cst_3 = arith.constant 3.906250e-03 : f32
    %8 = vector.broadcast %cst_3 : f32 to vector<8x1xf32>
    %9 = arith.mulf %7, %8 : vector<8x1xf32>
    %10 = arith.mulf %4, %4 : vector<8x1xf32>
    %11 = arith.subf %9, %10 : vector<8x1xf32>
    %cst_4 = arith.constant 0.000000e+00 : f32
    %12 = vector.broadcast %cst_4 : f32 to vector<8x1xf32>
    %13 = arith.maximumf %11, %12 : vector<8x1xf32>
    %c0_5 = arith.constant 0 : index
    %c0_6 = arith.constant 0 : index
    %14 = vector.load %arg2[%c0_5, %c0_6] : memref<8x1xf32, #tpu.memory_space<vmem>>, vector<8x1xf32>
    %cst_7 = arith.constant 9.99999974E-6 : f32
    %15 = vector.broadcast %cst_7 : f32 to vector<8x1xf32>
    %16 = arith.addf %13, %15 : vector<8x1xf32>
    %17 = math.rsqrt %16 : vector<8x1xf32>
    %18 = arith.mulf %14, %17 : vector<8x1xf32>
    %c0_8 = arith.constant 0 : index
    %c0_9 = arith.constant 0 : index
    %19 = vector.load %arg3[%c0_8, %c0_9] : memref<8x1xf32, #tpu.memory_space<vmem>>, vector<8x1xf32>
    %20 = arith.mulf %4, %18 : vector<8x1xf32>
    %21 = arith.subf %19, %20 : vector<8x1xf32>
    %22 = vector.broadcast %18 : vector<8x1xf32> to vector<8x256xf32>
    %23 = arith.mulf %0, %22 : vector<8x256xf32>
    %24 = vector.broadcast %21 : vector<8x1xf32> to vector<8x256xf32>
    %25 = arith.addf %23, %24 : vector<8x256xf32>
    %c0_10 = arith.constant 0 : index
    %c0_11 = arith.constant 0 : index
    %26 = vector.load %arg4[%c0_10, %c0_11] : memref<8x256xf32, #tpu.memory_space<vmem>>, vector<8x256xf32>
    tpu.vector_store %arg4[%c0_10, %c0_11], %25 {strides = array<i32>} : memref<8x256xf32, #tpu.memory_space<vmem>>, vector<8x256xf32>,
    return
  }
  func.func @transform_0(%arg0: i32) -> (i32, i32) {
    %c0_i32 = arith.constant 0 : i32
    %c0_i32_0 = arith.constant 0 : i32
    return %arg0, %c0_i32 : i32, i32
  }
  func.func @transform_1(%arg0: i32) -> (i32, i32) {
    %c0_i32 = arith.constant 0 : i32
    %c0_i32_0 = arith.constant 0 : i32
    return %arg0, %c0_i32 : i32, i32
  }
  func.func @transform_2(%arg0: i32) -> (i32, i32) {
    %c0_i32 = arith.constant 0 : i32
    %c0_i32_0 = arith.constant 0 : i32
    return %arg0, %c0_i32 : i32, i32
  }
  func.func @transform_3(%arg0: i32) -> (i32, i32) {
    %c0_i32 = arith.constant 0 : i32
    %c0_i32_0 = arith.constant 0 : i32
    return %arg0, %c0_i32 : i32, i32
  }
}

</mosaic_0001>

<bundles_post_ra>
// kernel: tpu_custom_call.1
= control target key start
LH: loop header
LB: loop body
LE: loop exit
PB: predicated region body
PF: predicated region fallthrough
CT: control target
= control target key end

     0   :  { %s147_s0 = inlined_call_operand.vmem [shape: f32[8,256], index: 0, kind: input, shape index: {}]   ;;  %s148_s1 = inlined_call_operand.vmem [shape: f32[8,1], index: 1, kind: input, shape index: {}]   ;;  %s149_s2 = inlined_call_operand.vmem [shape: f32[8,1], index: 2, kind: input, shape index: {}]   ;;  %s150_s3 = inlined_call_operand.hbm [shape: f32[8,256], index: 3, kind: output, shape index: {}]  }
   0x1   :  { %v15_v0 = vld [vmem:[%s147_s0] sm:$0xff]  ;;  %v16_v1 = vld [vmem:[%s147_s0 + $0x8] sm:$0xff] }
   0x2   :  { %8 = vsyncpa [#allocation3], 0  ;;  %v17_v2 = vadd.f32 %v16_v1, %v15_v0  ;;  %v21_v3 = vmul.f32 %v15_v0, %v15_v0  ;;  %v22_v4 = vmul.f32 %v16_v1, %v16_v1  ;;  %v110_v6 = vmov 0   ;;  %v30_v20 = vld [vmem:[%s148_s1] sm:$0xff]  ;;  %s111_s19 = smov [#allocation2]   ;;  %s69_s22 = sshll.u32 %s150_s3, 4  ;;  %s70_s22 = int_to_ptr.hbm [resolvable:$true] %s69_s22 }
   0x3   :  { %80 = vset.pattern.permute.xlu1 %v110_v6  ;;  %81 = vset.pattern.permute.xlu0 %v110_v6  ;;  %v43_v25 = vld [vmem:[%s149_s2] sm:$0xff]  ;;  %s67_s20 = sshll.u32 %s111_s19, 4  ;;  %s68_s20 = int_to_ptr.vmem [resolvable:$true] %s67_s20 }
   0x4   :  { %18 = vadd.xlane.f32.xlu0 %v17_v2  ;;  %v23_v5 = vadd.f32 %v22_v4, %v21_v3 }
   0xc   :  { %24 = vadd.xlane.f32.xlu0 %v23_v5 }
  0x77   :  { %v19_v7 = vpop.xlane.xlu0 %18 }
  0x78   :  { %v20_v8 = vmul.f32 0.00390625, %v19_v7 }
  0x7a   :  { %v27_v10 = vmul.f32 %v20_v8, %v20_v8 }
  0x7f   :  { %v25_v9 = vpop.xlane.xlu0 %24 }
  0x80   :  { %v26_v11 = vmul.f32 0.00390625, %v25_v9 }
  0x82   :  { %v28_v12 = vsub.f32 %v26_v11, %v27_v10 }
  0x84   :  { %v29_v13 = vmax.f32 %v28_v12, 0.0 }
  0x86   :  { %v31_v14 = vadd.f32 1e-05, %v29_v13 }
  0x88   :  { %82 = vrsqrt.f32 %v31_v14  ;;  %vm38_vm1 = vweird.f32 %v31_v14 }
  0x8e   :  { %v83_v15 = vpop.eup %82 }
  0x8f   :  { %v33_v16 = vmul.f32 %v83_v15, %v31_v14  ;;  %vm39_vm0 = vweird.f32 %v83_v15 }
  0x90   :  { %vm40_vm2 = vmor %vm38_vm1, %vm39_vm0 }
  0x91   :  { %v34_v17 = vmul.f32 %v83_v15, %v33_v16 }
  0x93   :  { %v35_v18 = vmul.f32 0.5, %v34_v17 }
  0x95   :  { %v36_v19 = vsub.f32 1.5, %v35_v18 }
  0x97   :  { %v37_v21 = vmul.f32 %v83_v15, %v36_v19 }
  0x99   :  { %v41_v22 = vsel %vm40_vm2, %v83_v15, %v37_v21 }
  0x9a   :  { %v42_v23 = vmul.f32 %v41_v22, %v30_v20 }
  0x9c   :  { %48 = vperm.xlu1 %80, %v42_v23   ;;  %v44_v24 = vmul.f32 %v42_v23, %v20_v8 }
  0x9e   :  { %v45_v26 = vsub.f32 %v43_v25, %v44_v24 }
  0xa4   :  { %55 = vperm.xlu1 %80, %v45_v26  }
 0x10e   :  { %v49_v27 = vpop.permute.xlu1 %48 }
 0x10f   :  { %v51_v28 = vmul.f32 %v49_v27, %v15_v0  ;;  %v52_v29 = vmul.f32 %v49_v27, %v16_v1 }
 0x116   :  { %v56_v30 = vpop.permute.xlu1 %55 }
 0x117   :  { %v58_v31 = vadd.f32 %v56_v30, %v51_v28  ;;  %v59_v32 = vadd.f32 %v56_v30, %v52_v29 }
 0x119   :  { %60 = vst [vmem:[#allocation2] sm:$0xff] %v58_v31 }
 0x11a   :  { %61 = vst [vmem:[#allocation2 + $0x8] sm:$0xff] %v59_v32 }
 0x11b   :  { %72 = dma.vmem_to_hbm [thread:$0]  %s68_s20, 256, %s70_s22, [#allocation3]  }
 0x11c   :  { %108 = dma.done.wait [#allocation3], 256  }
 0x11d   :  { %109 = vsyncadd [#allocation3], 4294967040 }
 0x11e   :  { %77 = vsyncpa [#allocation3], 1 }

</bundles_post_ra>
